<compile_context>
chip_gen: v6e
topology: v6e:2x2x1
jax: 0.10.0
libtpu: 0.0.40
codegen_flags: <defaults>
</compile_context>

<pallas_src>
import functools

import jax
import jax.numpy as jnp
import numpy as np
from jax.experimental import pallas as pl
from jax.experimental.pallas import tpu as pltpu

D_IN, D_H1, D_H2 = 995, 80, 50        # logical dims (match the PyTorch module)
D_IN_P, D_H_P = 1024, 128             # 128-aligned padded dims used inside the kernel


def sae_kernel(x_ref, w1_ref, b1_ref, w2_ref, b2_ref, w3_ref, b3_ref,
               w4_ref, b4_ref, o_ref):
    x = x_ref[...].astype(jnp.float32)

    # fc1 + ReLU
    h = jnp.dot(x, w1_ref[...], preferred_element_type=jnp.float32) + b1_ref[...]
    h = jnp.maximum(h, 0.0)
    # fc2 + ReLU
    h = jnp.dot(h, w2_ref[...], preferred_element_type=jnp.float32) + b2_ref[...]
    h = jnp.maximum(h, 0.0)
    # fc3 + ReLU
    h = jnp.dot(h, w3_ref[...], preferred_element_type=jnp.float32) + b3_ref[...]
    h = jnp.maximum(h, 0.0)
    # fc4 + sigmoid * 5
    logits = jnp.dot(h, w4_ref[...], preferred_element_type=jnp.float32) + b4_ref[...]
    o_ref[...] = (jax.nn.sigmoid(logits) * 5.0).astype(o_ref.dtype)


def _pad2(a, rows, cols):
    """Zero-pad a 2-D array up to (rows, cols)."""
    return jnp.pad(a, ((0, rows - a.shape[0]), (0, cols - a.shape[1])))


@functools.partial(jax.jit, static_argnames=("bm", "io_dtype"))
def sae_forward(x, params, *, bm=512, io_dtype=jnp.float32):
    w1, b1, w2, b2, w3, b3, w4, b4 = params
    B = x.shape[0]

    # Effective batch tile: big by default, but don't blow a tiny batch up to 512.
    bm_eff = min(bm, max(8, ((B + 7) // 8) * 8))
    n_blocks = pl.cdiv(B, bm_eff)
    B_pad = n_blocks * bm_eff

    # --- pad inputs / params to 128-aligned shapes (zeros keep the math exact) ---
    xp = _pad2(x, B_pad, D_IN_P).astype(io_dtype)

    w1p = _pad2(w1, D_IN_P, D_H_P)   # zero input rows (padded x cols) & output cols
    b1p = _pad2(b1, 1, D_H_P)        # padded lanes -> relu(0) = 0
    w2p = _pad2(w2, D_H_P, D_H_P)
    b2p = _pad2(b2, 1, D_H_P)
    w3p = _pad2(w3, D_H_P, D_H_P)
    b3p = _pad2(b3, 1, D_H_P)
    w4p = _pad2(w4, D_H_P, D_IN_P)   # padded output cols sliced off below
    b4p = _pad2(b4, 1, D_IN_P)

    # Weights/biases: full-array blocks, same block for every grid step.
    def full_spec(shape):
        return pl.BlockSpec(shape, lambda i: (0,) * len(shape))

    grid_spec = pltpu.PrefetchScalarGridSpec(
        num_scalar_prefetch=0,
        grid=(n_blocks,),
        in_specs=[
            pl.BlockSpec((bm_eff, D_IN_P), lambda i: (i, 0)),   # x batch tile
            full_spec(w1p.shape), full_spec(b1p.shape),
            full_spec(w2p.shape), full_spec(b2p.shape),
            full_spec(w3p.shape), full_spec(b3p.shape),
            full_spec(w4p.shape), full_spec(b4p.shape),
        ],
        out_specs=pl.BlockSpec((bm_eff, D_IN_P), lambda i: (i, 0)),
    )

    io_bytes = np.dtype(io_dtype).itemsize
    weight_bytes = 4 * (D_IN_P * D_H_P * 2 + D_H_P * D_H_P * 2 + 4 * D_H_P + 2 * D_IN_P)
    cost = pl.CostEstimate(
        flops=2 * B_pad * (D_IN_P * D_H_P + D_H_P * D_H_P
                           + D_H_P * D_H_P + D_H_P * D_IN_P),
        transcendentals=B_pad * D_IN_P,                       # sigmoid
        bytes_accessed=2 * B_pad * D_IN_P * io_bytes + weight_bytes,
    )

    out = pl.pallas_call(
        sae_kernel,
        out_shape=jax.ShapeDtypeStruct((B_pad, D_IN_P), io_dtype),
        grid_spec=grid_spec,
        compiler_params=pltpu.CompilerParams(
            dimension_semantics=("parallel",),        # shards batch tiles across TCs (v7x)
            vmem_limit_bytes=64 * 1024 * 1024,        # headroom for bm up to ~1024 in f32
        ),
        cost_estimate=cost,
    )(xp, w1p, b1p, w2p, b2p, w3p, b3p, w4p, b4p)

    # Drop batch padding and the padded feature columns (which hold sigmoid(0)*5).
    return out[:B, :D_IN].astype(jnp.float32)


def init_params(key):
    """Deterministic init mimicking torch.nn.Linear default: U(-1/sqrt(fan_in), +)."""
    def linear(key, fan_in, fan_out):
        kw, kb = jax.random.split(key)
        bound = 1.0 / np.sqrt(fan_in)
        w = jax.random.uniform(kw, (fan_in, fan_out), jnp.float32, -bound, bound)
        b = jax.random.uniform(kb, (1, fan_out), jnp.float32, -bound, bound)
        return w, b

    k1, k2, k3, k4 = jax.random.split(key, 4)
    w1, b1 = linear(k1, D_IN, D_H1)
    w2, b2 = linear(k2, D_H1, D_H2)
    w3, b3 = linear(k3, D_H2, D_H1)
    w4, b4 = linear(k4, D_H1, D_IN)
    return (w1, b1, w2, b2, w3, b3, w4, b4)


def sae_reference(x, params):
    w1, b1, w2, b2, w3, b3, w4, b4 = params
    h = jax.nn.relu(x @ w1 + b1)
    h = jax.nn.relu(h @ w2 + b2)
    h = jax.nn.relu(h @ w3 + b3)
    return jax.nn.sigmoid(h @ w4 + b4) * 5.0


if __name__ == "__main__":
    key = jax.random.PRNGKey(0)
    kx, kp = jax.random.split(key)
    params = init_params(kp)

    # Small, tile-aligned batch.
    B = 8
    x = jax.random.normal(kx, (B, D_IN), jnp.float32)
    out = jax.block_until_ready(sae_forward(x, params))
    ref = sae_reference(x, params)
    assert out.shape == (B, D_IN)
    assert np.allclose(np.asarray(out), np.asarray(ref), atol=2e-5, rtol=2e-5), (
        "Pallas SAE output mismatch vs reference (B=8)")

    # Ragged batch (exercises cdiv + batch padding path).
    B2 = 13
    x2 = jax.random.normal(kx, (B2, D_IN), jnp.float32)
    out2 = jax.block_until_ready(sae_forward(x2, params))
    ref2 = sae_reference(x2, params)
    assert out2.shape == (B2, D_IN)
    assert np.allclose(np.asarray(out2), np.asarray(ref2), atol=2e-5, rtol=2e-5), (
        "Pallas SAE output mismatch vs reference (B=13)")

    print("KERNEL_OK")
</pallas_src>

<mosaic_0001>
module attributes {stable_mosaic.version = 11 : i64} {
  func.func @sae_kernel(%arg0: i32, %arg1: memref<8x1024xf32, #tpu.memory_space<vmem>>, %arg2: memref<1024x128xf32, #tpu.memory_space<vmem>>, %arg3: memref<1x128xf32, #tpu.memory_space<vmem>>, %arg4: memref<128x128xf32, #tpu.memory_space<vmem>>, %arg5: memref<1x128xf32, #tpu.memory_space<vmem>>, %arg6: memref<128x128xf32, #tpu.memory_space<vmem>>, %arg7: memref<1x128xf32, #tpu.memory_space<vmem>>, %arg8: memref<128x1024xf32, #tpu.memory_space<vmem>>, %arg9: memref<1x1024xf32, #tpu.memory_space<vmem>>, %arg10: memref<8x1024xf32, #tpu.memory_space<vmem>>) attributes {dimension_semantics = [#tpu.dimension_semantics<parallel>], iteration_bounds = array<i64: 1>, scalar_prefetch = 0 : i64, scratch_operands = 0 : i64, tpu.core_type = #tpu.core_type<tc>, window_params = [{transform_indices = @transform_0, window_bounds = array<i64: 8, 1024>}, {pipeline_mode = #tpu.pipeline_mode<synchronous>, transform_indices = @transform_1, window_bounds = array<i64: 1024, 128>}, {pipeline_mode = #tpu.pipeline_mode<synchronous>, transform_indices = @transform_2, window_bounds = array<i64: 1, 128>}, {pipeline_mode = #tpu.pipeline_mode<synchronous>, transform_indices = @transform_3, window_bounds = array<i64: 128, 128>}, {pipeline_mode = #tpu.pipeline_mode<synchronous>, transform_indices = @transform_4, window_bounds = array<i64: 1, 128>}, {pipeline_mode = #tpu.pipeline_mode<synchronous>, transform_indices = @transform_5, window_bounds = array<i64: 128, 128>}, {pipeline_mode = #tpu.pipeline_mode<synchronous>, transform_indices = @transform_6, window_bounds = array<i64: 1, 128>}, {pipeline_mode = #tpu.pipeline_mode<synchronous>, transform_indices = @transform_7, window_bounds = array<i64: 128, 1024>}, {pipeline_mode = #tpu.pipeline_mode<synchronous>, transform_indices = @transform_8, window_bounds = array<i64: 1, 1024>}, {transform_indices = @transform_9, window_bounds = array<i64: 8, 1024>}]} {
    %c0 = arith.constant 0 : index
    %c0_0 = arith.constant 0 : index
    %0 = vector.load %arg1[%c0, %c0_0] : memref<8x1024xf32, #tpu.memory_space<vmem>>, vector<8x1024xf32>
    %c0_1 = arith.constant 0 : index
    %c0_2 = arith.constant 0 : index
    %1 = vector.load %arg2[%c0_1, %c0_2] : memref<1024x128xf32, #tpu.memory_space<vmem>>, vector<1024x128xf32>
    %cst = arith.constant dense<0.000000e+00> : vector<8x128xf32>
    %2 = tpu.matmul %0, %1, %cst {dimension_numbers = #tpu.dot_dimension_numbers<[1], [0], [0], [1], [0, 0, 1, 1], [], []>} : vector<8x1024xf32>, vector<1024x128xf32>, vector<8x128xf32> -> vector<8x128xf32>
    %c0_3 = arith.constant 0 : index
    %c0_4 = arith.constant 0 : index
    %3 = vector.load %arg3[%c0_3, %c0_4] : memref<1x128xf32, #tpu.memory_space<vmem>>, vector<1x128xf32>
    %4 = vector.broadcast %3 : vector<1x128xf32> to vector<8x128xf32>
    %5 = arith.addf %2, %4 : vector<8x128xf32>
    %cst_5 = arith.constant 0.000000e+00 : f32
    %6 = vector.broadcast %cst_5 : f32 to vector<8x128xf32>
    %7 = arith.maximumf %5, %6 : vector<8x128xf32>
    %c0_6 = arith.constant 0 : index
    %c0_7 = arith.constant 0 : index
    %8 = vector.load %arg4[%c0_6, %c0_7] : memref<128x128xf32, #tpu.memory_space<vmem>>, vector<128x128xf32>
    %cst_8 = arith.constant dense<0.000000e+00> : vector<8x128xf32>
    %9 = tpu.matmul %7, %8, %cst_8 {dimension_numbers = #tpu.dot_dimension_numbers<[1], [0], [0], [1], [0, 0, 1, 1], [], []>} : vector<8x128xf32>, vector<128x128xf32>, vector<8x128xf32> -> vector<8x128xf32>
    %c0_9 = arith.constant 0 : index
    %c0_10 = arith.constant 0 : index
    %10 = vector.load %arg5[%c0_9, %c0_10] : memref<1x128xf32, #tpu.memory_space<vmem>>, vector<1x128xf32>
    %11 = vector.broadcast %10 : vector<1x128xf32> to vector<8x128xf32>
    %12 = arith.addf %9, %11 : vector<8x128xf32>
    %cst_11 = arith.constant 0.000000e+00 : f32
    %13 = vector.broadcast %cst_11 : f32 to vector<8x128xf32>
    %14 = arith.maximumf %12, %13 : vector<8x128xf32>
    %c0_12 = arith.constant 0 : index
    %c0_13 = arith.constant 0 : index
    %15 = vector.load %arg6[%c0_12, %c0_13] : memref<128x128xf32, #tpu.memory_space<vmem>>, vector<128x128xf32>
    %cst_14 = arith.constant dense<0.000000e+00> : vector<8x128xf32>
    %16 = tpu.matmul %14, %15, %cst_14 {dimension_numbers = #tpu.dot_dimension_numbers<[1], [0], [0], [1], [0, 0, 1, 1], [], []>} : vector<8x128xf32>, vector<128x128xf32>, vector<8x128xf32> -> vector<8x128xf32>
    %c0_15 = arith.constant 0 : index
    %c0_16 = arith.constant 0 : index
    %17 = vector.load %arg7[%c0_15, %c0_16] : memref<1x128xf32, #tpu.memory_space<vmem>>, vector<1x128xf32>
    %18 = vector.broadcast %17 : vector<1x128xf32> to vector<8x128xf32>
    %19 = arith.addf %16, %18 : vector<8x128xf32>
    %cst_17 = arith.constant 0.000000e+00 : f32
    %20 = vector.broadcast %cst_17 : f32 to vector<8x128xf32>
    %21 = arith.maximumf %19, %20 : vector<8x128xf32>
    %c0_18 = arith.constant 0 : index
    %c0_19 = arith.constant 0 : index
    %22 = vector.load %arg8[%c0_18, %c0_19] : memref<128x1024xf32, #tpu.memory_space<vmem>>, vector<128x1024xf32>
    %cst_20 = arith.constant dense<0.000000e+00> : vector<8x1024xf32>
    %23 = tpu.matmul %21, %22, %cst_20 {dimension_numbers = #tpu.dot_dimension_numbers<[1], [0], [0], [1], [0, 0, 1, 1], [], []>} : vector<8x128xf32>, vector<128x1024xf32>, vector<8x1024xf32> -> vector<8x1024xf32>
    %c0_21 = arith.constant 0 : index
    %c0_22 = arith.constant 0 : index
    %24 = vector.load %arg9[%c0_21, %c0_22] : memref<1x1024xf32, #tpu.memory_space<vmem>>, vector<1x1024xf32>
    %25 = vector.broadcast %24 : vector<1x1024xf32> to vector<8x1024xf32>
    %26 = arith.addf %23, %25 : vector<8x1024xf32>
    %27 = arith.negf %26 : vector<8x1024xf32>
    %28 = math.exp %27 : vector<8x1024xf32>
    %cst_23 = arith.constant 1.000000e+00 : f32
    %29 = vector.broadcast %cst_23 : f32 to vector<8x1024xf32>
    %30 = arith.addf %29, %28 : vector<8x1024xf32>
    %31 = arith.divf %29, %30 : vector<8x1024xf32>
    %cst_24 = arith.constant 5.000000e+00 : f32
    %32 = vector.broadcast %cst_24 : f32 to vector<8x1024xf32>
    %33 = arith.mulf %31, %32 : vector<8x1024xf32>
    %c0_25 = arith.constant 0 : index
    %c0_26 = arith.constant 0 : index
    %34 = vector.load %arg10[%c0_25, %c0_26] : memref<8x1024xf32, #tpu.memory_space<vmem>>, vector<8x1024xf32>
    tpu.vector_store %arg10[%c0_25, %c0_26], %33 {strides = array<i32>} : memref<8x1024xf32, #tpu.memory_space<vmem>>, vector<8x1024xf32>,
    return
  }
  func.func @transform_0(%arg0: i32) -> (i32, i32) {
    %c0_i32 = arith.constant 0 : i32
    %c0_i32_0 = arith.constant 0 : i32
    return %arg0, %c0_i32 : i32, i32
  }
  func.func @transform_1(%arg0: i32) -> (i32, i32) {
    %c0_i32 = arith.constant 0 : i32
    %c0_i32_0 = arith.constant 0 : i32
    %c0_i32_1 = arith.constant 0 : i32
    return %c0_i32, %c0_i32_0 : i32, i32
  }
  func.func @transform_2(%arg0: i32) -> (i32, i32) {
    %c0_i32 = arith.constant 0 : i32
    %c0_i32_0 = arith.constant 0 : i32
    %c0_i32_1 = arith.constant 0 : i32
    return %c0_i32, %c0_i32_0 : i32, i32
  }
  func.func @transform_3(%arg0: i32) -> (i32, i32) {
    %c0_i32 = arith.constant 0 : i32
    %c0_i32_0 = arith.constant 0 : i32
    %c0_i32_1 = arith.constant 0 : i32
    return %c0_i32, %c0_i32_0 : i32, i32
  }
  func.func @transform_4(%arg0: i32) -> (i32, i32) {
    %c0_i32 = arith.constant 0 : i32
    %c0_i32_0 = arith.constant 0 : i32
    %c0_i32_1 = arith.constant 0 : i32
    return %c0_i32, %c0_i32_0 : i32, i32
  }
  func.func @transform_5(%arg0: i32) -> (i32, i32) {
    %c0_i32 = arith.constant 0 : i32
    %c0_i32_0 = arith.constant 0 : i32
    %c0_i32_1 = arith.constant 0 : i32
    return %c0_i32, %c0_i32_0 : i32, i32
  }
  func.func @transform_6(%arg0: i32) -> (i32, i32) {
    %c0_i32 = arith.constant 0 : i32
    %c0_i32_0 = arith.constant 0 : i32
    %c0_i32_1 = arith.constant 0 : i32
    return %c0_i32, %c0_i32_0 : i32, i32
  }
  func.func @transform_7(%arg0: i32) -> (i32, i32) {
    %c0_i32 = arith.constant 0 : i32
    %c0_i32_0 = arith.constant 0 : i32
    %c0_i32_1 = arith.constant 0 : i32
    return %c0_i32, %c0_i32_0 : i32, i32
  }
  func.func @transform_8(%arg0: i32) -> (i32, i32) {
    %c0_i32 = arith.constant 0 : i32
    %c0_i32_0 = arith.constant 0 : i32
    %c0_i32_1 = arith.constant 0 : i32
    return %c0_i32, %c0_i32_0 : i32, i32
  }
  func.func @transform_9(%arg0: i32) -> (i32, i32) {
    %c0_i32 = arith.constant 0 : i32
    %c0_i32_0 = arith.constant 0 : i32
    return %arg0, %c0_i32 : i32, i32
  }
}

</mosaic_0001>

<bundles_post_ra>
// kernel: sae_forward.1
= control target key start
LH: loop header
LB: loop body
LE: loop exit
PB: predicated region body
PF: predicated region fallthrough
CT: control target
= control target key end

     0   :  { %s2489_s0 = inlined_call_operand.vmem [shape: f32[8,1024], index: 0, kind: input, shape index: {}]   ;;  %s2490_s1 = inlined_call_operand.vmem [shape: f32[1024,128], index: 1, kind: input, shape index: {}]   ;;  %s2491_s2 = inlined_call_operand.vmem [shape: f32[1,128], index: 2, kind: input, shape index: {}]   ;;  %s2492_s3 = inlined_call_operand.vmem [shape: f32[128,128], index: 3, kind: input, shape index: {}]   ;;  %s2493_s4 = inlined_call_operand.vmem [shape: f32[1,128], index: 4, kind: input, shape index: {}]   ;;  %s2494_s5 = inlined_call_operand.vmem [shape: f32[128,128], index: 5, kind: input, shape index: {}]   ;;  %s2495_s6 = inlined_call_operand.vmem [shape: f32[1,128], index: 6, kind: input, shape index: {}]   ;;  %s2496_s7 = inlined_call_operand.vmem [shape: f32[128,1024], index: 7, kind: input, shape index: {}]   ;;  %s2497_s8 = inlined_call_operand.vmem [shape: f32[1,1024], index: 8, kind: input, shape index: {}]   ;;  %s2498_s9 = inlined_call_operand.hbm [shape: f32[8,1024], index: 9, kind: output, shape index: {}]  }
   0x1   :  { %v72_v0 = vld [vmem:[%s2490_s1 + $0xf8] sm:$0xff]  ;;  %v71_v4 = vld [vmem:[%s2490_s1 + $0xf0] sm:$0xff]  ;;  %v70_v8 = vld [vmem:[%s2490_s1 + $0xe8] sm:$0xff] }
   0x2   :  { %v104_v1 = vld [vmem:[%s2490_s1 + $0x1f8] sm:$0xff]  ;;  %1188 = vmatprep.subr.mxu0 %v72_v0  ;;  %v103_v5 = vld [vmem:[%s2490_s1 + $0x1f0] sm:$0xff]  ;;  %v102_v9 = vld [vmem:[%s2490_s1 + $0x1e8] sm:$0xff] }
   0x3   :  { %v56_v2 = vld [vmem:[%s2490_s1 + $0x78] sm:$0xff]  ;;  %1223 = vmatprep.subr.mxu1 %v104_v1  ;;  %v55_v6 = vld [vmem:[%s2490_s1 + $0x70] sm:$0xff]  ;;  %v54_v10 = vld [vmem:[%s2490_s1 + $0x68] sm:$0xff] }
   0x4   :  { %v88_v3 = vld [vmem:[%s2490_s1 + $0x178] sm:$0xff]  ;;  %1189 = vmatpush3.msra.mxu0 %v56_v2  ;;  %v87_v7 = vld [vmem:[%s2490_s1 + $0x170] sm:$0xff]  ;;  %v86_v11 = vld [vmem:[%s2490_s1 + $0x168] sm:$0xff] }
   0x5   :  { %1224 = vmatpush3.msra.mxu1 %v88_v3  ;;  %1190 = vmatprep.subr.mxu0 %v71_v4  ;;  %v69_v12 = vld [vmem:[%s2490_s1 + $0xe0] sm:$0xff]  ;;  %v68_v16 = vld [vmem:[%s2490_s1 + $0xd8] sm:$0xff]  ;;  %v67_v20 = vld [vmem:[%s2490_s1 + $0xd0] sm:$0xff] }
   0x6   :  { %1225 = vmatprep.subr.mxu1 %v103_v5  ;;  %1191 = vmatpush3.msra.mxu0 %v55_v6  ;;  %v101_v13 = vld [vmem:[%s2490_s1 + $0x1e0] sm:$0xff]  ;;  %v100_v17 = vld [vmem:[%s2490_s1 + $0x1d8] sm:$0xff]  ;;  %v99_v21 = vld [vmem:[%s2490_s1 + $0x1d0] sm:$0xff] }
   0x7   :  { %1226 = vmatpush3.msra.mxu1 %v87_v7  ;;  %1192 = vmatprep.subr.mxu0 %v70_v8  ;;  %v53_v14 = vld [vmem:[%s2490_s1 + $0x60] sm:$0xff]  ;;  %v52_v18 = vld [vmem:[%s2490_s1 + $0x58] sm:$0xff]  ;;  %v51_v22 = vld [vmem:[%s2490_s1 + $0x50] sm:$0xff] }
   0x8   :  { %1227 = vmatprep.subr.mxu1 %v102_v9  ;;  %v85_v15 = vld [vmem:[%s2490_s1 + $0x160] sm:$0xff]  ;;  %1193 = vmatpush3.msra.mxu0 %v54_v10  ;;  %v84_v19 = vld [vmem:[%s2490_s1 + $0x158] sm:$0xff]  ;;  %v83_v23 = vld [vmem:[%s2490_s1 + $0x150] sm:$0xff] }
   0x9   :  { %1228 = vmatpush3.msra.mxu1 %v86_v11  ;;  %1194 = vmatprep.subr.mxu0 %v69_v12  ;;  %v66_v24 = vld [vmem:[%s2490_s1 + $0xc8] sm:$0xff]  ;;  %v65_v28 = vld [vmem:[%s2490_s1 + $0xc0] sm:$0xff]  ;;  %v64_v32 = vld [vmem:[%s2490_s1 + $0xb8] sm:$0xff] }
   0xa   :  { %1229 = vmatprep.subr.mxu1 %v101_v13  ;;  %1195 = vmatpush3.msra.mxu0 %v53_v14  ;;  %v98_v25 = vld [vmem:[%s2490_s1 + $0x1c8] sm:$0xff]  ;;  %v97_v29 = vld [vmem:[%s2490_s1 + $0x1c0] sm:$0xff]  ;;  %v96_v33 = vld [vmem:[%s2490_s1 + $0x1b8] sm:$0xff] }
   0xb   :  { %1230 = vmatpush3.msra.mxu1 %v85_v15  ;;  %1196 = vmatprep.subr.mxu0 %v68_v16  ;;  %v50_v26 = vld [vmem:[%s2490_s1 + $0x48] sm:$0xff]  ;;  %v49_v30 = vld [vmem:[%s2490_s1 + $0x40] sm:$0xff]  ;;  %v48_v34 = vld [vmem:[%s2490_s1 + $0x38] sm:$0xff] }
   0xc   :  { %1231 = vmatprep.subr.mxu1 %v100_v17  ;;  %1197 = vmatpush3.msra.mxu0 %v52_v18  ;;  %v82_v27 = vld [vmem:[%s2490_s1 + $0x148] sm:$0xff]  ;;  %v81_v31 = vld [vmem:[%s2490_s1 + $0x140] sm:$0xff]  ;;  %v80_v35 = vld [vmem:[%s2490_s1 + $0x138] sm:$0xff] }
   0xd   :  { %1232 = vmatpush3.msra.mxu1 %v84_v19  ;;  %1198 = vmatprep.subr.mxu0 %v67_v20  ;;  %v63_v36 = vld [vmem:[%s2490_s1 + $0xb0] sm:$0xff]  ;;  %v62_v40 = vld [vmem:[%s2490_s1 + $0xa8] sm:$0xff]  ;;  %v61_v44 = vld [vmem:[%s2490_s1 + $0xa0] sm:$0xff] }
   0xe   :  { %1233 = vmatprep.subr.mxu1 %v99_v21  ;;  %1199 = vmatpush3.msra.mxu0 %v51_v22  ;;  %v95_v37 = vld [vmem:[%s2490_s1 + $0x1b0] sm:$0xff]  ;;  %v94_v41 = vld [vmem:[%s2490_s1 + $0x1a8] sm:$0xff]  ;;  %v93_v45 = vld [vmem:[%s2490_s1 + $0x1a0] sm:$0xff] }
   0xf   :  { %1234 = vmatpush3.msra.mxu1 %v83_v23  ;;  %1200 = vmatprep.subr.mxu0 %v66_v24  ;;  %v47_v38 = vld [vmem:[%s2490_s1 + $0x30] sm:$0xff]  ;;  %v46_v42 = vld [vmem:[%s2490_s1 + $0x28] sm:$0xff]  ;;  %v45_v46 = vld [vmem:[%s2490_s1 + $0x20] sm:$0xff] }
  0x10   :  { %1235 = vmatprep.subr.mxu1 %v98_v25  ;;  %1201 = vmatpush3.msra.mxu0 %v50_v26  ;;  %v79_v39 = vld [vmem:[%s2490_s1 + $0x130] sm:$0xff]  ;;  %v78_v43 = vld [vmem:[%s2490_s1 + $0x128] sm:$0xff]  ;;  %v77_v47 = vld [vmem:[%s2490_s1 + $0x120] sm:$0xff] }
  0x11   :  { %1236 = vmatpush3.msra.mxu1 %v82_v27  ;;  %1202 = vmatprep.subr.mxu0 %v65_v28  ;;  %v60_v48 = vld [vmem:[%s2490_s1 + $0x98] sm:$0xff]  ;;  %v59_v52 = vld [vmem:[%s2490_s1 + $0x90] sm:$0xff]  ;;  %v58_v56 = vld [vmem:[%s2490_s1 + $0x88] sm:$0xff] }
  0x12   :  { %1237 = vmatprep.subr.mxu1 %v97_v29  ;;  %1203 = vmatpush3.msra.mxu0 %v49_v30  ;;  %v92_v49 = vld [vmem:[%s2490_s1 + $0x198] sm:$0xff]  ;;  %v91_v53 = vld [vmem:[%s2490_s1 + $0x190] sm:$0xff]  ;;  %v90_v57 = vld [vmem:[%s2490_s1 + $0x188] sm:$0xff] }
  0x13   :  { %1238 = vmatpush3.msra.mxu1 %v81_v31  ;;  %1204 = vmatprep.subr.mxu0 %v64_v32  ;;  %v44_v50 = vld [vmem:[%s2490_s1 + $0x18] sm:$0xff]  ;;  %v43_v54 = vld [vmem:[%s2490_s1 + $0x10] sm:$0xff]  ;;  %v42_v58 = vld [vmem:[%s2490_s1 + $0x8] sm:$0xff] }
  0x14   :  { %1239 = vmatprep.subr.mxu1 %v96_v33  ;;  %1205 = vmatpush3.msra.mxu0 %v48_v34  ;;  %v76_v51 = vld [vmem:[%s2490_s1 + $0x118] sm:$0xff]  ;;  %v75_v55 = vld [vmem:[%s2490_s1 + $0x110] sm:$0xff]  ;;  %v74_v59 = vld [vmem:[%s2490_s1 + $0x108] sm:$0xff] }
  0x15   :  { %1240 = vmatpush3.msra.mxu1 %v80_v35  ;;  %1206 = vmatprep.subr.mxu0 %v63_v36  ;;  %v57_v60 = vld [vmem:[%s2490_s1 + $0x80] sm:$0xff]  ;;  %v34_v63 = vld [vmem:[%s2489_s0 + $0x8] sm:$0xff]  ;;  %v36_v2 = vld [vmem:[%s2489_s0 + $0x18] sm:$0xff] }
  0x16   :  { %1241 = vmatprep.subr.mxu1 %v95_v37  ;;  %1207 = vmatpush3.msra.mxu0 %v47_v38  ;;  %v89_v61 = vld [vmem:[%s2490_s1 + $0x180] sm:$0xff]  ;;  %v136_v3 = vld [vmem:[%s2490_s1 + $0x2f8] sm:$0xff]  ;;  %v35_v5 = vld [vmem:[%s2489_s0 + $0x10] sm:$0xff] }
  0x17   :  { %1242 = vmatpush3.msra.mxu1 %v79_v39  ;;  %1208 = vmatprep.subr.mxu0 %v62_v40  ;;  %v41_v62 = vld [vmem:[%s2490_s1] sm:$0xff]  ;;  %v168_v4 = vld [vmem:[%s2490_s1 + $0x3f8] sm:$0xff]  ;;  %v135_v8 = vld [vmem:[%s2490_s1 + $0x2f0] sm:$0xff] }
  0x18   :  { %1243 = vmatprep.subr.mxu1 %v94_v41  ;;  %1209 = vmatpush3.msra.mxu0 %v46_v42  ;;  %v73_v0 = vld [vmem:[%s2490_s1 + $0x100] sm:$0xff]  ;;  %v120_v6 = vld [vmem:[%s2490_s1 + $0x278] sm:$0xff]  ;;  %v167_v9 = vld [vmem:[%s2490_s1 + $0x3f0] sm:$0xff] }
  0x19   :  { %1244 = vmatpush3.msra.mxu1 %v78_v43  ;;  %1210 = vmatprep.subr.mxu0 %v61_v44  ;;  %v33_v1 = vld [vmem:[%s2489_s0] sm:$0xff]  ;;  %v152_v7 = vld [vmem:[%s2490_s1 + $0x378] sm:$0xff]  ;;  %v119_v10 = vld [vmem:[%s2490_s1 + $0x270] sm:$0xff] }
  0x1a   :  { %1245 = vmatprep.subr.mxu1 %v93_v45  ;;  %1211 = vmatpush3.msra.mxu0 %v45_v46  ;;  %v151_v11 = vld [vmem:[%s2490_s1 + $0x370] sm:$0xff]  ;;  %v134_v12 = vld [vmem:[%s2490_s1 + $0x2e8] sm:$0xff]  ;;  %v133_v16 = vld [vmem:[%s2490_s1 + $0x2e0] sm:$0xff] }
  0x1b   :  { %1246 = vmatpush3.msra.mxu1 %v77_v47  ;;  %1212 = vmatprep.subr.mxu0 %v60_v48  ;;  %v166_v13 = vld [vmem:[%s2490_s1 + $0x3e8] sm:$0xff]  ;;  %v165_v17 = vld [vmem:[%s2490_s1 + $0x3e0] sm:$0xff]  ;;  %v132_v20 = vld [vmem:[%s2490_s1 + $0x2d8] sm:$0xff] }
  0x1c   :  { %1247 = vmatprep.subr.mxu1 %v92_v49  ;;  %1213 = vmatpush3.msra.mxu0 %v44_v50  ;;  %v118_v14 = vld [vmem:[%s2490_s1 + $0x268] sm:$0xff]  ;;  %v117_v18 = vld [vmem:[%s2490_s1 + $0x260] sm:$0xff]  ;;  %v164_v21 = vld [vmem:[%s2490_s1 + $0x3d8] sm:$0xff] }
  0x1d   :  { %1248 = vmatpush3.msra.mxu1 %v76_v51  ;;  %1214 = vmatprep.subr.mxu0 %v59_v52  ;;  %v150_v15 = vld [vmem:[%s2490_s1 + $0x368] sm:$0xff]  ;;  %v149_v19 = vld [vmem:[%s2490_s1 + $0x360] sm:$0xff]  ;;  %v116_v22 = vld [vmem:[%s2490_s1 + $0x258] sm:$0xff] }
  0x1e   :  { %1249 = vmatprep.subr.mxu1 %v91_v53  ;;  %1215 = vmatpush3.msra.mxu0 %v43_v54  ;;  %v148_v23 = vld [vmem:[%s2490_s1 + $0x358] sm:$0xff]  ;;  %v131_v24 = vld [vmem:[%s2490_s1 + $0x2d0] sm:$0xff]  ;;  %v130_v28 = vld [vmem:[%s2490_s1 + $0x2c8] sm:$0xff] }
  0x1f   :  { %1250 = vmatpush3.msra.mxu1 %v75_v55  ;;  %1216 = vmatprep.subr.mxu0 %v58_v56  ;;  %v163_v25 = vld [vmem:[%s2490_s1 + $0x3d0] sm:$0xff]  ;;  %v162_v29 = vld [vmem:[%s2490_s1 + $0x3c8] sm:$0xff] }
  0x20   :  { %1251 = vmatprep.subr.mxu1 %v90_v57  ;;  %1217 = vmatpush3.msra.mxu0 %v42_v58  ;;  %v115_v26 = vld [vmem:[%s2490_s1 + $0x250] sm:$0xff]  ;;  %v114_v30 = vld [vmem:[%s2490_s1 + $0x248] sm:$0xff] }
  0x21   :  { %1252 = vmatpush3.msra.mxu1 %v74_v59  ;;  %1218 = vmatprep.subr.mxu0 %v57_v60  ;;  %v147_v27 = vld [vmem:[%s2490_s1 + $0x350] sm:$0xff]  ;;  %v146_v31 = vld [vmem:[%s2490_s1 + $0x348] sm:$0xff] }
  0x22   :  { %1253 = vmatprep.subr.mxu1 %v89_v61  ;;  %1219 = vmatpush3.msra.mxu0 %v41_v62 }
  0x23   :  { %240 = vmatprep.mubr.f32.mxu0 %v34_v63  ;;  %1254 = vmatpush3.msra.mxu1 %v73_v0 }
  0x24   :  { %241 = vmatmul.mubr.f32.vlgmr.msra.gmra.mxu0 %v33_v1  ;;  %310 = vmatprep.mubr.f32.mxu1 %v36_v2 }
  0x25   :  { %1258 = vmatprep.subr.mxu0 %v136_v3  ;;  %1293 = vmatprep.subr.mxu1 %v168_v4 }
  0x26   :  { %311 = vmatmul.mubr.f32.vlgmr.msra.gmra.mxu1 %v35_v5  ;;  %1259 = vmatpush3.msra.mxu0 %v120_v6 }
  0x27   :  { %1294 = vmatpush3.msra.mxu1 %v152_v7  ;;  %1260 = vmatprep.subr.mxu0 %v135_v8 }
  0x28   :  { %1295 = vmatprep.subr.mxu1 %v167_v9  ;;  %1261 = vmatpush3.msra.mxu0 %v119_v10 }
  0x29   :  { %1296 = vmatpush3.msra.mxu1 %v151_v11  ;;  %1262 = vmatprep.subr.mxu0 %v134_v12 }
  0x2a   :  { %1297 = vmatprep.subr.mxu1 %v166_v13  ;;  %1263 = vmatpush3.msra.mxu0 %v118_v14 }
  0x2b   :  { %1298 = vmatpush3.msra.mxu1 %v150_v15  ;;  %1264 = vmatprep.subr.mxu0 %v133_v16 }
  0x2c   :  { %1299 = vmatprep.subr.mxu1 %v165_v17  ;;  %1265 = vmatpush3.msra.mxu0 %v117_v18 }
  0x2d   :  { %1300 = vmatpush3.msra.mxu1 %v149_v19  ;;  %1266 = vmatprep.subr.mxu0 %v132_v20 }
  0x2e   :  { %1301 = vmatprep.subr.mxu1 %v164_v21  ;;  %1267 = vmatpush3.msra.mxu0 %v116_v22 }
  0x2f   :  { %1302 = vmatpush3.msra.mxu1 %v148_v23  ;;  %1268 = vmatprep.subr.mxu0 %v131_v24 }
  0x30   :  { %1303 = vmatprep.subr.mxu1 %v163_v25 }
  0x31   :  { %14 = vsyncpa [#allocation3], 0  ;;  %1269 = vmatpush3.msra.mxu0 %v115_v26  ;;  %1304 = vmatpush3.msra.mxu1 %v147_v27  ;;  %v129_v32 = vld [vmem:[%s2490_s1 + $0x2c0] sm:$0xff]  ;;  %v128_v36 = vld [vmem:[%s2490_s1 + $0x2b8] sm:$0xff]  ;;  %v1489_v9 = vmov 0.0   ;;  %vm1490_vm0 = vmmov 0  }
  0x32   :  { %v161_v33 = vld [vmem:[%s2490_s1 + $0x3c0] sm:$0xff]  ;;  %1270 = vmatprep.subr.mxu0 %v130_v28  ;;  %1305 = vmatprep.subr.mxu1 %v162_v29  ;;  %v160_v37 = vld [vmem:[%s2490_s1 + $0x3b8] sm:$0xff]  ;;  %v127_v40 = vld [vmem:[%s2490_s1 + $0x2b0] sm:$0xff] }
  0x33   :  { %v113_v34 = vld [vmem:[%s2490_s1 + $0x240] sm:$0xff]  ;;  %1271 = vmatpush3.msra.mxu0 %v114_v30  ;;  %1306 = vmatpush3.msra.mxu1 %v146_v31  ;;  %v112_v38 = vld [vmem:[%s2490_s1 + $0x238] sm:$0xff]  ;;  %v159_v41 = vld [vmem:[%s2490_s1 + $0x3b0] sm:$0xff] }
  0x34   :  { %v145_v35 = vld [vmem:[%s2490_s1 + $0x340] sm:$0xff]  ;;  %1272 = vmatprep.subr.mxu0 %v129_v32  ;;  %1307 = vmatprep.subr.mxu1 %v161_v33  ;;  %v144_v39 = vld [vmem:[%s2490_s1 + $0x338] sm:$0xff]  ;;  %v111_v42 = vld [vmem:[%s2490_s1 + $0x230] sm:$0xff] }
  0x35   :  { %1273 = vmatpush3.msra.mxu0 %v113_v34  ;;  %1308 = vmatpush3.msra.mxu1 %v145_v35  ;;  %v143_v43 = vld [vmem:[%s2490_s1 + $0x330] sm:$0xff]  ;;  %v126_v44 = vld [vmem:[%s2490_s1 + $0x2a8] sm:$0xff]  ;;  %v125_v48 = vld [vmem:[%s2490_s1 + $0x2a0] sm:$0xff] }
  0x36   :  { %1274 = vmatprep.subr.mxu0 %v128_v36  ;;  %1309 = vmatprep.subr.mxu1 %v160_v37  ;;  %v158_v45 = vld [vmem:[%s2490_s1 + $0x3a8] sm:$0xff]  ;;  %v157_v49 = vld [vmem:[%s2490_s1 + $0x3a0] sm:$0xff]  ;;  %v124_v52 = vld [vmem:[%s2490_s1 + $0x298] sm:$0xff] }
  0x37   :  { %1275 = vmatpush3.msra.mxu0 %v112_v38  ;;  %1310 = vmatpush3.msra.mxu1 %v144_v39  ;;  %v110_v46 = vld [vmem:[%s2490_s1 + $0x228] sm:$0xff]  ;;  %v109_v50 = vld [vmem:[%s2490_s1 + $0x220] sm:$0xff]  ;;  %v156_v53 = vld [vmem:[%s2490_s1 + $0x398] sm:$0xff] }
  0x38   :  { %1276 = vmatprep.subr.mxu0 %v127_v40  ;;  %1311 = vmatprep.subr.mxu1 %v159_v41  ;;  %v142_v47 = vld [vmem:[%s2490_s1 + $0x328] sm:$0xff]  ;;  %v141_v51 = vld [vmem:[%s2490_s1 + $0x320] sm:$0xff]  ;;  %v108_v54 = vld [vmem:[%s2490_s1 + $0x218] sm:$0xff] }
  0x39   :  { %1277 = vmatpush3.msra.mxu0 %v111_v42  ;;  %1312 = vmatpush3.msra.mxu1 %v143_v43  ;;  %v140_v55 = vld [vmem:[%s2490_s1 + $0x318] sm:$0xff]  ;;  %v123_v56 = vld [vmem:[%s2490_s1 + $0x290] sm:$0xff]  ;;  %v122_v60 = vld [vmem:[%s2490_s1 + $0x288] sm:$0xff] }
  0x3a   :  { %1278 = vmatprep.subr.mxu0 %v126_v44  ;;  %1313 = vmatprep.subr.mxu1 %v158_v45  ;;  %v155_v57 = vld [vmem:[%s2490_s1 + $0x390] sm:$0xff]  ;;  %v154_v61 = vld [vmem:[%s2490_s1 + $0x388] sm:$0xff]  ;;  %v121_v0 = vld [vmem:[%s2490_s1 + $0x280] sm:$0xff] }
  0x3b   :  { %1279 = vmatpush3.msra.mxu0 %v110_v46  ;;  %1314 = vmatpush3.msra.mxu1 %v142_v47  ;;  %v107_v58 = vld [vmem:[%s2490_s1 + $0x210] sm:$0xff]  ;;  %v106_v62 = vld [vmem:[%s2490_s1 + $0x208] sm:$0xff]  ;;  %v153_v1 = vld [vmem:[%s2490_s1 + $0x380] sm:$0xff] }
  0x3c   :  { %1280 = vmatprep.subr.mxu0 %v125_v48  ;;  %1315 = vmatprep.subr.mxu1 %v157_v49  ;;  %v139_v59 = vld [vmem:[%s2490_s1 + $0x310] sm:$0xff]  ;;  %v138_v63 = vld [vmem:[%s2490_s1 + $0x308] sm:$0xff]  ;;  %v105_v2 = vld [vmem:[%s2490_s1 + $0x200] sm:$0xff] }
  0x3d   :  { %1281 = vmatpush3.msra.mxu0 %v109_v50  ;;  %1316 = vmatpush3.msra.mxu1 %v141_v51  ;;  %v38_v3 = vld [vmem:[%s2489_s0 + $0x28] sm:$0xff]  ;;  %v137_v4 = vld [vmem:[%s2490_s1 + $0x300] sm:$0xff]  ;;  %v40_v5 = vld [vmem:[%s2489_s0 + $0x38] sm:$0xff] }
  0x3e   :  { %1282 = vmatprep.subr.mxu0 %v124_v52  ;;  %1317 = vmatprep.subr.mxu1 %v156_v53  ;;  %v37_v6 = vld [vmem:[%s2489_s0 + $0x20] sm:$0xff]  ;;  %v39_v7 = vld [vmem:[%s2489_s0 + $0x30] sm:$0xff]  ;;  %v472_v8 = vld [vmem:[%s2492_s3 + $0x78] sm:$0xff] }
  0x3f   :  { %1283 = vmatpush3.msra.mxu0 %v108_v54  ;;  %1318 = vmatpush3.msra.mxu1 %v140_v55  ;;  %v471_v10 = vld [vmem:[%s2492_s3 + $0x70] sm:$0xff]  ;;  %v470_v11 = vld [vmem:[%s2492_s3 + $0x68] sm:$0xff]  ;;  %v469_v12 = vld [vmem:[%s2492_s3 + $0x60] sm:$0xff] }
  0x40   :  { %1284 = vmatprep.subr.mxu0 %v123_v56  ;;  %1319 = vmatprep.subr.mxu1 %v155_v57  ;;  %v468_v13 = vld [vmem:[%s2492_s3 + $0x58] sm:$0xff]  ;;  %v467_v14 = vld [vmem:[%s2492_s3 + $0x50] sm:$0xff]  ;;  %v466_v15 = vld [vmem:[%s2492_s3 + $0x48] sm:$0xff] }
  0x41   :  { %1285 = vmatpush3.msra.mxu0 %v107_v58  ;;  %1320 = vmatpush3.msra.mxu1 %v139_v59  ;;  %v465_v16 = vld [vmem:[%s2492_s3 + $0x40] sm:$0xff]  ;;  %v464_v17 = vld [vmem:[%s2492_s3 + $0x38] sm:$0xff]  ;;  %v463_v18 = vld [vmem:[%s2492_s3 + $0x30] sm:$0xff] }
  0x42   :  { %1286 = vmatprep.subr.mxu0 %v122_v60  ;;  %1321 = vmatprep.subr.mxu1 %v154_v61  ;;  %v462_v19 = vld [vmem:[%s2492_s3 + $0x28] sm:$0xff]  ;;  %v461_v20 = vld [vmem:[%s2492_s3 + $0x20] sm:$0xff]  ;;  %v460_v21 = vld [vmem:[%s2492_s3 + $0x18] sm:$0xff] }
  0x43   :  { %1287 = vmatpush3.msra.mxu0 %v106_v62  ;;  %1322 = vmatpush3.msra.mxu1 %v138_v63  ;;  %v459_v22 = vld [vmem:[%s2492_s3 + $0x10] sm:$0xff]  ;;  %v458_v23 = vld [vmem:[%s2492_s3 + $0x8] sm:$0xff]  ;;  %v457_v24 = vld [vmem:[%s2492_s3] sm:$0xff] }
  0x44   :  { %1288 = vmatprep.subr.mxu0 %v121_v0  ;;  %1323 = vmatprep.subr.mxu1 %v153_v1  ;;  %v566_v25 = vld [vmem:[%s2494_s5 + $0x78] sm:$0xff]  ;;  %v565_v26 = vld [vmem:[%s2494_s5 + $0x70] sm:$0xff]  ;;  %v564_v27 = vld [vmem:[%s2494_s5 + $0x68] sm:$0xff] }
  0x45   :  { %1289 = vmatpush3.msra.mxu0 %v105_v2  ;;  %380 = vmatprep.mubr.f32.mxu0 %v38_v3  ;;  %v563_v28 = vld [vmem:[%s2494_s5 + $0x60] sm:$0xff]  ;;  %v562_v29 = vld [vmem:[%s2494_s5 + $0x58] sm:$0xff]  ;;  %v561_v30 = vld [vmem:[%s2494_s5 + $0x50] sm:$0xff] }
  0x46   :  { %1324 = vmatpush3.msra.mxu1 %v137_v4  ;;  %450 = vmatprep.mubr.f32.mxu1 %v40_v5  ;;  %v560_v31 = vld [vmem:[%s2494_s5 + $0x48] sm:$0xff]  ;;  %v559_v32 = vld [vmem:[%s2494_s5 + $0x40] sm:$0xff]  ;;  %v558_v33 = vld [vmem:[%s2494_s5 + $0x38] sm:$0xff] }
  0x47   :  { %381 = vmatmul.mubr.f32.vlgmr.msra.gmra.mxu0 %v37_v6  ;;  %451 = vmatmul.mubr.f32.vlgmr.msra.gmra.mxu1 %v39_v7  ;;  %v557_v34 = vld [vmem:[%s2494_s5 + $0x30] sm:$0xff]  ;;  %v556_v35 = vld [vmem:[%s2494_s5 + $0x28] sm:$0xff]  ;;  %v555_v36 = vld [vmem:[%s2494_s5 + $0x20] sm:$0xff] }
  0x48   :  { %1362 = vmatprep.subr.mxu0 %v1489_v9  ;;  %1397 = vmatprep.subr.mxu1 %v1489_v9  ;;  %v554_v37 = vld [vmem:[%s2494_s5 + $0x18] sm:$0xff]  ;;  %v1177_v42 = vld [vmem:[%s2491_s2] ss:$0 sm:$0xff]  ;;  %v553_v56 = vld [vmem:[%s2494_s5 + $0x10] sm:$0xff] }
  0x49   :  { %1363 = vmatpush3.msra.mxu0 %v472_v8  ;;  %1394 = vmatprep.mubr.msk.f32.mxu0 %vm1490_vm0, %v1489_v9  ;;  %v552_v57 = vld [vmem:[%s2494_s5 + $0x8] sm:$0xff]  ;;  %v551_v58 = vld [vmem:[%s2494_s5] sm:$0xff]  ;;  %v768_v60 = vld [vmem:[%s2496_s7 + $0x3d8] sm:$0xff] }
  0x4a   :  { %1364 = vmatprep.subr.mxu0 %v1489_v9  ;;  %1429 = vmatprep.mubr.msk.f32.mxu1 %vm1490_vm0, %v1489_v9  ;;  %v766_v59 = vld [vmem:[%s2496_s7 + $0x3c8] sm:$0xff]  ;;  %v765_v61 = vld [vmem:[%s2496_s7 + $0x3c0] sm:$0xff] }
  0x4b   :  { %1365 = vmatpush3.msra.mxu0 %v471_v10  ;;  %1398 = vmatpush3.msra.mxu1 %v566_v25  ;;  %v758_v62 = vld [vmem:[%s2496_s7 + $0x388] sm:$0xff]  ;;  %v757_v63 = vld [vmem:[%s2496_s7 + $0x380] sm:$0xff] }
  0x4c   :  { %1366 = vmatprep.subr.mxu0 %v1489_v9  ;;  %1399 = vmatprep.subr.mxu1 %v1489_v9  ;;  %v750_v0 = vld [vmem:[%s2496_s7 + $0x348] sm:$0xff]  ;;  %v749_v1 = vld [vmem:[%s2496_s7 + $0x340] sm:$0xff] }
  0x4d   :  { %1367 = vmatpush3.msra.mxu0 %v470_v11  ;;  %1400 = vmatpush3.msra.mxu1 %v565_v26  ;;  %v742_v2 = vld [vmem:[%s2496_s7 + $0x308] sm:$0xff]  ;;  %v741_v3 = vld [vmem:[%s2496_s7 + $0x300] sm:$0xff] }
  0x4e   :  { %1368 = vmatprep.subr.mxu0 %v1489_v9  ;;  %1401 = vmatprep.subr.mxu1 %v1489_v9  ;;  %v734_v4 = vld [vmem:[%s2496_s7 + $0x2c8] sm:$0xff]  ;;  %v733_v5 = vld [vmem:[%s2496_s7 + $0x2c0] sm:$0xff] }
  0x4f   :  { %1369 = vmatpush3.msra.mxu0 %v469_v12  ;;  %1402 = vmatpush3.msra.mxu1 %v564_v27  ;;  %v726_v6 = vld [vmem:[%s2496_s7 + $0x288] sm:$0xff]  ;;  %v725_v7 = vld [vmem:[%s2496_s7 + $0x280] sm:$0xff] }
  0x50   :  { %1370 = vmatprep.subr.mxu0 %v1489_v9  ;;  %1403 = vmatprep.subr.mxu1 %v1489_v9  ;;  %v718_v8 = vld [vmem:[%s2496_s7 + $0x248] sm:$0xff]  ;;  %v717_v10 = vld [vmem:[%s2496_s7 + $0x240] sm:$0xff] }
  0x51   :  { %1371 = vmatpush3.msra.mxu0 %v468_v13  ;;  %1404 = vmatpush3.msra.mxu1 %v563_v28  ;;  %v710_v11 = vld [vmem:[%s2496_s7 + $0x208] sm:$0xff]  ;;  %v709_v12 = vld [vmem:[%s2496_s7 + $0x200] sm:$0xff] }
  0x52   :  { %1372 = vmatprep.subr.mxu0 %v1489_v9  ;;  %1405 = vmatprep.subr.mxu1 %v1489_v9  ;;  %v702_v13 = vld [vmem:[%s2496_s7 + $0x1c8] sm:$0xff]  ;;  %v1178_v25 = vld [vmem:[%s2493_s4] ss:$0 sm:$0xff] }
  0x53   :  { %1373 = vmatpush3.msra.mxu0 %v467_v14  ;;  %1406 = vmatpush3.msra.mxu1 %v562_v29  ;;  %v701_v14 = vld [vmem:[%s2496_s7 + $0x1c0] sm:$0xff] }
  0x54   :  { %1374 = vmatprep.subr.mxu0 %v1489_v9  ;;  %1407 = vmatprep.subr.mxu1 %v1489_v9 }
  0x55   :  { %1375 = vmatpush3.msra.mxu0 %v466_v15  ;;  %1408 = vmatpush3.msra.mxu1 %v561_v30  ;;  %v694_v15 = vld [vmem:[%s2496_s7 + $0x188] sm:$0xff]  ;;  %v767_v30 = vld [vmem:[%s2496_s7 + $0x3d0] sm:$0xff] }
  0x56   :  { %1376 = vmatprep.subr.mxu0 %v1489_v9  ;;  %1409 = vmatprep.subr.mxu1 %v1489_v9 }
  0x57   :  { %1377 = vmatpush3.msra.mxu0 %v465_v16  ;;  %1410 = vmatpush3.msra.mxu1 %v560_v31  ;;  %v693_v16 = vld [vmem:[%s2496_s7 + $0x180] sm:$0xff]  ;;  %v760_v31 = vld [vmem:[%s2496_s7 + $0x398] sm:$0xff] }
  0x58   :  { %1378 = vmatprep.subr.mxu0 %v1489_v9  ;;  %1411 = vmatprep.subr.mxu1 %v1489_v9 }
  0x59   :  { %1379 = vmatpush3.msra.mxu0 %v464_v17  ;;  %1412 = vmatpush3.msra.mxu1 %v559_v32  ;;  %v686_v17 = vld [vmem:[%s2496_s7 + $0x148] sm:$0xff]  ;;  %v759_v32 = vld [vmem:[%s2496_s7 + $0x390] sm:$0xff] }
  0x5a   :  { %1380 = vmatprep.subr.mxu0 %v1489_v9  ;;  %1413 = vmatprep.subr.mxu1 %v1489_v9 }
  0x5b   :  { %1381 = vmatpush3.msra.mxu0 %v463_v18  ;;  %1414 = vmatpush3.msra.mxu1 %v558_v33  ;;  %v685_v18 = vld [vmem:[%s2496_s7 + $0x140] sm:$0xff]  ;;  %v752_v33 = vld [vmem:[%s2496_s7 + $0x358] sm:$0xff] }
  0x5c   :  { %1382 = vmatprep.subr.mxu0 %v1489_v9  ;;  %1415 = vmatprep.subr.mxu1 %v1489_v9 }
  0x5d   :  { %1383 = vmatpush3.msra.mxu0 %v462_v19  ;;  %1416 = vmatpush3.msra.mxu1 %v557_v34  ;;  %v678_v19 = vld [vmem:[%s2496_s7 + $0x108] sm:$0xff]  ;;  %v751_v34 = vld [vmem:[%s2496_s7 + $0x350] sm:$0xff] }
  0x5e   :  { %1384 = vmatprep.subr.mxu0 %v1489_v9  ;;  %1417 = vmatprep.subr.mxu1 %v1489_v9 }
  0x5f   :  { %1385 = vmatpush3.msra.mxu0 %v461_v20  ;;  %1418 = vmatpush3.msra.mxu1 %v556_v35  ;;  %v677_v20 = vld [vmem:[%s2496_s7 + $0x100] sm:$0xff]  ;;  %v744_v35 = vld [vmem:[%s2496_s7 + $0x318] sm:$0xff] }
  0x60   :  { %1386 = vmatprep.subr.mxu0 %v1489_v9  ;;  %1419 = vmatprep.subr.mxu1 %v1489_v9 }
  0x61   :  { %1387 = vmatpush3.msra.mxu0 %v460_v21  ;;  %1420 = vmatpush3.msra.mxu1 %v555_v36  ;;  %v670_v21 = vld [vmem:[%s2496_s7 + $0xc8] sm:$0xff]  ;;  %v743_v36 = vld [vmem:[%s2496_s7 + $0x310] sm:$0xff] }
  0x62   :  { %1388 = vmatprep.subr.mxu0 %v1489_v9  ;;  %1421 = vmatprep.subr.mxu1 %v1489_v9 }
  0x63   :  { %1389 = vmatpush3.msra.mxu0 %v459_v22  ;;  %1422 = vmatpush3.msra.mxu1 %v554_v37  ;;  %v669_v22 = vld [vmem:[%s2496_s7 + $0xc0] sm:$0xff]  ;;  %v736_v37 = vld [vmem:[%s2496_s7 + $0x2d8] sm:$0xff] }
  0x64   :  { %1390 = vmatprep.subr.mxu0 %v1489_v9  ;;  %1423 = vmatprep.subr.mxu1 %v1489_v9 }
  0x65   :  { %1391 = vmatpush3.msra.mxu0 %v458_v23  ;;  %1424 = vmatpush3.msra.mxu1 %v553_v56  ;;  %v662_v23 = vld [vmem:[%s2496_s7 + $0x88] sm:$0xff]  ;;  %v663_v56 = vld [vmem:[%s2496_s7 + $0x90] sm:$0xff] }
  0x66   :  { %1392 = vmatprep.subr.mxu0 %v1489_v9  ;;  %1425 = vmatprep.subr.mxu1 %v1489_v9 }
  0x67   :  { %1393 = vmatpush3.msra.mxu0 %v457_v24  ;;  %1426 = vmatpush3.msra.mxu1 %v552_v57  ;;  %v661_v24 = vld [vmem:[%s2496_s7 + $0x80] sm:$0xff]  ;;  %v654_v57 = vld [vmem:[%s2496_s7 + $0x48] sm:$0xff] }
  0x68   :  { %1427 = vmatprep.subr.mxu1 %v1489_v9  ;;  %815 = vmatprep.subr.mxu0 %v766_v59  ;;  %v653_v59 = vld [vmem:[%s2496_s7 + $0x40] sm:$0xff] }
  0x69   :  { %1428 = vmatpush3.msra.mxu1 %v551_v58  ;;  %v656_v58 = vld [vmem:[%s2496_s7 + $0x58] sm:$0xff] }
  0x6a   :  { %886 = vmatprep.subr.mxu1 %v768_v60  ;;  %v655_v60 = vld [vmem:[%s2496_s7 + $0x50] sm:$0xff] }
  0xe4   :  { %v1220_v38 = vpop.f32.mrf.mxu0 }
  0xe6   :  { %v1255_v39 = vpop.f32.mrf.mxu1  ;;  %v1221_v40 = vpop.f32.mrf.mxu0 }
  0xe7   :  { %v1222_v41 = vadd.f32 %v1221_v40, %v1220_v38  ;;  %v735_v38 = vld [vmem:[%s2496_s7 + $0x2d0] sm:$0xff] }
  0xe8   :  { %v1256_v43 = vpop.f32.mrf.mxu1  ;;  %v727_v40 = vld [vmem:[%s2496_s7 + $0x290] sm:$0xff] }
  0xe9   :  { %v243_v44 = vadd.f32 %v1222_v41, %v1177_v42  ;;  %v1257_v45 = vadd.f32 %v1256_v43, %v1255_v39  ;;  %v728_v39 = vld [vmem:[%s2496_s7 + $0x298] sm:$0xff]  ;;  %v719_v42 = vld [vmem:[%s2496_s7 + $0x250] sm:$0xff] }
  0xea   :  { %v720_v41 = vld [vmem:[%s2496_s7 + $0x258] sm:$0xff] }
  0xeb   :  { %v313_v50 = vadd.f32 %v1257_v45, %v243_v44  ;;  %v712_v43 = vld [vmem:[%s2496_s7 + $0x218] sm:$0xff]  ;;  %v711_v44 = vld [vmem:[%s2496_s7 + $0x210] sm:$0xff] }
  0xec   :  { %v704_v45 = vld [vmem:[%s2496_s7 + $0x1d8] sm:$0xff] }
 0x107   :  { %v1290_v46 = vpop.f32.mrf.mxu0  ;;  %v1325_v47 = vpop.f32.mrf.mxu1 }
 0x109   :  { %v1291_v48 = vpop.f32.mrf.mxu0  ;;  %v1326_v49 = vpop.f32.mrf.mxu1 }
 0x10a   :  { %v1292_v51 = vadd.f32 %v1291_v48, %v1290_v46  ;;  %v1327_v53 = vadd.f32 %v1326_v49, %v1325_v47  ;;  %v703_v46 = vld [vmem:[%s2496_s7 + $0x1d0] sm:$0xff]  ;;  %v696_v47 = vld [vmem:[%s2496_s7 + $0x198] sm:$0xff] }
 0x10b   :  { %v695_v48 = vld [vmem:[%s2496_s7 + $0x190] sm:$0xff]  ;;  %v688_v49 = vld [vmem:[%s2496_s7 + $0x158] sm:$0xff] }
 0x10c   :  { %v383_v52 = vadd.f32 %v1292_v51, %v313_v50  ;;  %v687_v50 = vld [vmem:[%s2496_s7 + $0x150] sm:$0xff]  ;;  %v680_v51 = vld [vmem:[%s2496_s7 + $0x118] sm:$0xff] }
 0x10e   :  { %v453_v54 = vadd.f32 %v1327_v53, %v383_v52  ;;  %v679_v52 = vld [vmem:[%s2496_s7 + $0x110] sm:$0xff]  ;;  %v672_v53 = vld [vmem:[%s2496_s7 + $0xd8] sm:$0xff] }
 0x110   :  { %v456_v55 = vmax.f32 %v453_v54, 0.0  ;;  %v671_v54 = vld [vmem:[%s2496_s7 + $0xd0] sm:$0xff] }
 0x112   :  { %1395 = vmatmul.mubr.f32.vlgmr.msra.gmra.mxu0 %v456_v55  ;;  %v664_v55 = vld [vmem:[%s2496_s7 + $0x98] sm:$0xff] }
 0x113   :  { %879 = vmatprep.mubr.f32.mxu0 %v1489_v9  ;;  %816 = vmatpush1.msra.mxu0 %v765_v61  ;;  %v646_v61 = vld [vmem:[%s2496_s7 + $0x8] sm:$0xff] }
 0x114   :  { %817 = vmatprep.subr.mxu0 %v758_v62  ;;  %v648_v62 = vld [vmem:[%s2496_s7 + $0x18] sm:$0xff] }
 0x115   :  { %818 = vmatpush1.msra.mxu0 %v757_v63  ;;  %v645_v63 = vld [vmem:[%s2496_s7] sm:$0xff] }
 0x116   :  { %819 = vmatprep.subr.mxu0 %v750_v0  ;;  %v647_v0 = vld [vmem:[%s2496_s7 + $0x10] sm:$0xff] }
 0x117   :  { %820 = vmatpush1.msra.mxu0 %v749_v1  ;;  %v770_v1 = vld [vmem:[%s2496_s7 + $0x3e8] sm:$0xff] }
 0x118   :  { %821 = vmatprep.subr.mxu0 %v742_v2  ;;  %v772_v2 = vld [vmem:[%s2496_s7 + $0x3f8] sm:$0xff] }
 0x119   :  { %822 = vmatpush1.msra.mxu0 %v741_v3  ;;  %v1179_v3 = vld [vmem:[%s2495_s6] ss:$0 sm:$0xff] }
 0x11a   :  { %823 = vmatprep.subr.mxu0 %v734_v4 }
 0x11b   :  { %824 = vmatpush1.msra.mxu0 %v733_v5 }
 0x11c   :  { %825 = vmatprep.subr.mxu0 %v726_v6 }
 0x11d   :  { %826 = vmatpush1.msra.mxu0 %v725_v7 }
 0x11e   :  { %827 = vmatprep.subr.mxu0 %v718_v8  ;;  %v769_v8 = vld [vmem:[%s2496_s7 + $0x3e0] sm:$0xff] }
 0x11f   :  { %828 = vmatpush1.msra.mxu0 %v717_v10  ;;  %v771_v10 = vld [vmem:[%s2496_s7 + $0x3f0] sm:$0xff] }
 0x120   :  { %829 = vmatprep.subr.mxu0 %v710_v11  ;;  %v762_v11 = vld [vmem:[%s2496_s7 + $0x3a8] sm:$0xff] }
 0x121   :  { %830 = vmatpush1.msra.mxu0 %v709_v12  ;;  %v764_v12 = vld [vmem:[%s2496_s7 + $0x3b8] sm:$0xff] }
 0x122   :  { %831 = vmatprep.subr.mxu0 %v702_v13  ;;  %v761_v13 = vld [vmem:[%s2496_s7 + $0x3a0] sm:$0xff] }
 0x123   :  { %832 = vmatpush1.msra.mxu0 %v701_v14  ;;  %v763_v14 = vld [vmem:[%s2496_s7 + $0x3b0] sm:$0xff] }
 0x124   :  { %833 = vmatprep.subr.mxu0 %v694_v15  ;;  %v754_v15 = vld [vmem:[%s2496_s7 + $0x368] sm:$0xff] }
 0x125   :  { %834 = vmatpush1.msra.mxu0 %v693_v16  ;;  %v756_v16 = vld [vmem:[%s2496_s7 + $0x378] sm:$0xff] }
 0x126   :  { %835 = vmatprep.subr.mxu0 %v686_v17  ;;  %v753_v17 = vld [vmem:[%s2496_s7 + $0x360] sm:$0xff] }
 0x127   :  { %836 = vmatpush1.msra.mxu0 %v685_v18  ;;  %v755_v18 = vld [vmem:[%s2496_s7 + $0x370] sm:$0xff] }
 0x128   :  { %837 = vmatprep.subr.mxu0 %v678_v19  ;;  %v746_v19 = vld [vmem:[%s2496_s7 + $0x328] sm:$0xff] }
 0x129   :  { %838 = vmatpush1.msra.mxu0 %v677_v20  ;;  %v748_v20 = vld [vmem:[%s2496_s7 + $0x338] sm:$0xff] }
 0x12a   :  { %839 = vmatprep.subr.mxu0 %v670_v21  ;;  %v745_v21 = vld [vmem:[%s2496_s7 + $0x320] sm:$0xff] }
 0x12b   :  { %840 = vmatpush1.msra.mxu0 %v669_v22  ;;  %v747_v22 = vld [vmem:[%s2496_s7 + $0x330] sm:$0xff] }
 0x12c   :  { %841 = vmatprep.subr.mxu0 %v662_v23  ;;  %v738_v23 = vld [vmem:[%s2496_s7 + $0x2e8] sm:$0xff] }
 0x12d   :  { %842 = vmatpush1.msra.mxu0 %v661_v24  ;;  %v740_v24 = vld [vmem:[%s2496_s7 + $0x2f8] sm:$0xff] }
 0x12e   :  { %843 = vmatprep.subr.mxu0 %v654_v57  ;;  %v673_v57 = vld [vmem:[%s2496_s7 + $0xe0] sm:$0xff] }
 0x12f   :  { %844 = vmatpush1.msra.mxu0 %v653_v59  ;;  %v666_v59 = vld [vmem:[%s2496_s7 + $0xa8] sm:$0xff] }
 0x130   :  { %845 = vmatprep.subr.mxu0 %v646_v61  ;;  %v665_v61 = vld [vmem:[%s2496_s7 + $0xa0] sm:$0xff] }
 0x131   :  { %846 = vmatpush1.msra.mxu0 %v645_v63  ;;  %v658_v63 = vld [vmem:[%s2496_s7 + $0x68] sm:$0xff] }
 0x132   :  { %957 = vmatprep.subr.mxu0 %v770_v1  ;;  %v657_v1 = vld [vmem:[%s2496_s7 + $0x60] sm:$0xff] }
 0x1d2   :  { %v546_v26 = vpop.f32.mrf.mxu0 }
 0x1d3   :  { %v547_v27 = vadd.f32 %v1178_v25, %v546_v26  ;;  %v737_v25 = vld [vmem:[%s2496_s7 + $0x2e0] sm:$0xff]  ;;  %v739_v26 = vld [vmem:[%s2496_s7 + $0x2f0] sm:$0xff] }
 0x1d4   :  { %v1396_v28 = vpop.f32.mrf.mxu0 }
 0x1d5   :  { %v550_v29 = vmax.f32 %v547_v27, 0.0  ;;  %v730_v27 = vld [vmem:[%s2496_s7 + $0x2a8] sm:$0xff]  ;;  %v732_v28 = vld [vmem:[%s2496_s7 + $0x2b8] sm:$0xff] }
 0x1d7   :  { %1430 = vmatmul.mubr.f32.vlgmr.msra.gmra.mxu1 %v550_v29  ;;  %v729_v29 = vld [vmem:[%s2496_s7 + $0x2a0] sm:$0xff] }
 0x1d8   :  { %887 = vmatpush1.msra.mxu1 %v767_v30  ;;  %950 = vmatprep.mubr.f32.mxu1 %v1489_v9  ;;  %v731_v30 = vld [vmem:[%s2496_s7 + $0x2b0] sm:$0xff] }
 0x1d9   :  { %888 = vmatprep.subr.mxu1 %v760_v31  ;;  %v722_v31 = vld [vmem:[%s2496_s7 + $0x268] sm:$0xff] }
 0x1da   :  { %889 = vmatpush1.msra.mxu1 %v759_v32  ;;  %v724_v32 = vld [vmem:[%s2496_s7 + $0x278] sm:$0xff] }
 0x1db   :  { %890 = vmatprep.subr.mxu1 %v752_v33  ;;  %v721_v33 = vld [vmem:[%s2496_s7 + $0x260] sm:$0xff] }
 0x1dc   :  { %891 = vmatpush1.msra.mxu1 %v751_v34  ;;  %v723_v34 = vld [vmem:[%s2496_s7 + $0x270] sm:$0xff] }
 0x1dd   :  { %892 = vmatprep.subr.mxu1 %v744_v35  ;;  %v714_v35 = vld [vmem:[%s2496_s7 + $0x228] sm:$0xff] }
 0x1de   :  { %893 = vmatpush1.msra.mxu1 %v743_v36  ;;  %v716_v36 = vld [vmem:[%s2496_s7 + $0x238] sm:$0xff] }
 0x1df   :  { %894 = vmatprep.subr.mxu1 %v736_v37  ;;  %v713_v37 = vld [vmem:[%s2496_s7 + $0x220] sm:$0xff] }
 0x1e0   :  { %895 = vmatpush1.msra.mxu1 %v735_v38  ;;  %v715_v38 = vld [vmem:[%s2496_s7 + $0x230] sm:$0xff] }
 0x1e1   :  { %896 = vmatprep.subr.mxu1 %v728_v39  ;;  %v706_v39 = vld [vmem:[%s2496_s7 + $0x1e8] sm:$0xff] }
 0x1e2   :  { %897 = vmatpush1.msra.mxu1 %v727_v40  ;;  %v708_v40 = vld [vmem:[%s2496_s7 + $0x1f8] sm:$0xff] }
 0x1e3   :  { %898 = vmatprep.subr.mxu1 %v720_v41  ;;  %v705_v41 = vld [vmem:[%s2496_s7 + $0x1e0] sm:$0xff] }
 0x1e4   :  { %899 = vmatpush1.msra.mxu1 %v719_v42  ;;  %v707_v42 = vld [vmem:[%s2496_s7 + $0x1f0] sm:$0xff] }
 0x1e5   :  { %900 = vmatprep.subr.mxu1 %v712_v43  ;;  %v698_v43 = vld [vmem:[%s2496_s7 + $0x1a8] sm:$0xff] }
 0x1e6   :  { %901 = vmatpush1.msra.mxu1 %v711_v44  ;;  %v700_v44 = vld [vmem:[%s2496_s7 + $0x1b8] sm:$0xff] }
 0x1e7   :  { %902 = vmatprep.subr.mxu1 %v704_v45  ;;  %v697_v45 = vld [vmem:[%s2496_s7 + $0x1a0] sm:$0xff] }
 0x1e8   :  { %903 = vmatpush1.msra.mxu1 %v703_v46  ;;  %v699_v46 = vld [vmem:[%s2496_s7 + $0x1b0] sm:$0xff] }
 0x1e9   :  { %904 = vmatprep.subr.mxu1 %v696_v47  ;;  %v690_v47 = vld [vmem:[%s2496_s7 + $0x168] sm:$0xff] }
 0x1ea   :  { %905 = vmatpush1.msra.mxu1 %v695_v48  ;;  %v692_v48 = vld [vmem:[%s2496_s7 + $0x178] sm:$0xff] }
 0x1eb   :  { %906 = vmatprep.subr.mxu1 %v688_v49  ;;  %v689_v49 = vld [vmem:[%s2496_s7 + $0x160] sm:$0xff] }
 0x1ec   :  { %907 = vmatpush1.msra.mxu1 %v687_v50  ;;  %v691_v50 = vld [vmem:[%s2496_s7 + $0x170] sm:$0xff] }
 0x1ed   :  { %908 = vmatprep.subr.mxu1 %v680_v51  ;;  %v682_v51 = vld [vmem:[%s2496_s7 + $0x128] sm:$0xff] }
 0x1ee   :  { %909 = vmatpush1.msra.mxu1 %v679_v52  ;;  %v684_v52 = vld [vmem:[%s2496_s7 + $0x138] sm:$0xff] }
 0x1ef   :  { %910 = vmatprep.subr.mxu1 %v672_v53  ;;  %v681_v53 = vld [vmem:[%s2496_s7 + $0x120] sm:$0xff] }
 0x1f0   :  { %911 = vmatpush1.msra.mxu1 %v671_v54  ;;  %v683_v54 = vld [vmem:[%s2496_s7 + $0x130] sm:$0xff] }
 0x1f1   :  { %912 = vmatprep.subr.mxu1 %v664_v55  ;;  %v674_v55 = vld [vmem:[%s2496_s7 + $0xe8] sm:$0xff] }
 0x1f2   :  { %913 = vmatpush1.msra.mxu1 %v663_v56  ;;  %v676_v56 = vld [vmem:[%s2496_s7 + $0xf8] sm:$0xff] }
 0x1f3   :  { %914 = vmatprep.subr.mxu1 %v656_v58  ;;  %v675_v58 = vld [vmem:[%s2496_s7 + $0xf0] sm:$0xff] }
 0x1f4   :  { %915 = vmatpush1.msra.mxu1 %v655_v60  ;;  %v668_v60 = vld [vmem:[%s2496_s7 + $0xb8] sm:$0xff] }
 0x1f5   :  { %916 = vmatprep.subr.mxu1 %v648_v62  ;;  %v667_v62 = vld [vmem:[%s2496_s7 + $0xb0] sm:$0xff] }
 0x1f6   :  { %917 = vmatpush1.msra.mxu1 %v647_v0  ;;  %v660_v0 = vld [vmem:[%s2496_s7 + $0x78] sm:$0xff] }
 0x1f7   :  { %1028 = vmatprep.subr.mxu1 %v772_v2  ;;  %v659_v2 = vld [vmem:[%s2496_s7 + $0x70] sm:$0xff] }
 0x297   :  { %v640_v4 = vpop.f32.mrf.mxu1 }
 0x298   :  { %v641_v5 = vadd.f32 %v1179_v3, %v640_v4  ;;  %v650_v3 = vld [vmem:[%s2496_s7 + $0x28] sm:$0xff]  ;;  %v652_v4 = vld [vmem:[%s2496_s7 + $0x38] sm:$0xff] }
 0x299   :  { %v1431_v6 = vpop.f32.mrf.mxu1 }
 0x29a   :  { %v2289_v7 = vmax.f32 %v641_v5, 0.0  ;;  %v649_v5 = vld [vmem:[%s2496_s7 + $0x20] sm:$0xff]  ;;  %v651_v6 = vld [vmem:[%s2496_s7 + $0x30] sm:$0xff]  ;;  %s1491_s7 = smov [#allocation2]  }
 0x29c   :  { %880 = vmatmul.mubr.f32.vlgmr.msra.gmra.mxu0 %v2289_v7  ;;  %951 = vmatmul.mubr.f32.vlgmr.msra.gmra.mxu1 %v2289_v7 }
 0x29d   :  { %958 = vmatpush1.msra.mxu0 %v769_v8  ;;  %1029 = vmatpush1.msra.mxu1 %v771_v10  ;;  %v775_v8 = vlaneseq }
 0x29e   :  { %959 = vmatprep.subr.mxu0 %v762_v11  ;;  %1030 = vmatprep.subr.mxu1 %v764_v12 }
 0x29f   :  { %960 = vmatpush1.msra.mxu0 %v761_v13  ;;  %1031 = vmatpush1.msra.mxu1 %v763_v14  ;;  %v776_v10 = vshrl.u32 %v775_v8, 7  ;;  %v773_v13 = vld [vmem:[%s2497_s8] sm:$0xff]  ;;  %s1169_s8 = sshll.u32 %s1491_s7, 4  ;;  %s1170_s8 = int_to_ptr.vmem [resolvable:$true] %s1169_s8 }
 0x2a0   :  { %961 = vmatprep.subr.mxu0 %v754_v15  ;;  %1032 = vmatprep.subr.mxu1 %v756_v16  ;;  %s1467_s14 = scalar_lea.vmem %s1170_s8, 1024  ;;  %p1472_p1 = scmp.lt.s32.totalorder %s1170_s8, %s1170_s8 }
 0x2a1   :  { %962 = vmatpush1.msra.mxu0 %v753_v17  ;;  %1033 = vmatpush1.msra.mxu1 %v755_v18  ;;  %v777_v11 = vsub.s32 0, %v776_v10  ;;  %v785_v12 = vsub.s32 2, %v776_v10  ;;  %v781_v14 = vsub.s32 1, %v776_v10  ;;  %v789_v15 = vsub.s32 3, %v776_v10  ;;  %p1468_p0 = scmp.ne.s32.totalorder %s1170_s8, %s1467_s14  ;;  %p1473_p2 = scmp.lt.s32.totalorder %s1467_s14, %s1467_s14 }
 0x2a2   :  { %963 = vmatprep.subr.mxu0 %v746_v19  ;;  %1034 = vmatprep.subr.mxu1 %v748_v20 }
 0x2a3   :  { %964 = vmatpush1.msra.mxu0 %v745_v21  ;;  %1035 = vmatpush1.msra.mxu1 %v747_v22  ;;  %v778_v16 = vrot.slane %v773_v13, %v777_v11  ;;  %v786_v17 = vrot.slane %v773_v13, %v785_v12  ;;  %v782_v18 = vrot.slane %v773_v13, %v781_v14  ;;  %p1474_p3 = por %p1473_p2, %p1472_p1 }
 0x2a4   :  { %965 = vmatprep.subr.mxu0 %v738_v23  ;;  %1036 = vmatprep.subr.mxu1 %v740_v24  ;;  %v790_v19 = vrot.slane %v773_v13, %v789_v15 }
 0x2a5   :  { %966 = vmatpush1.msra.mxu0 %v737_v25  ;;  %1037 = vmatpush1.msra.mxu1 %v739_v26  ;;  %p1475_p4 = pnand %p1474_p3, %p1468_p0 }
 0x2a6   :  { %967 = vmatprep.subr.mxu0 %v730_v27  ;;  %1038 = vmatprep.subr.mxu1 %v732_v28 }
 0x2a7   :  { %968 = vmatpush1.msra.mxu0 %v729_v29  ;;  %1039 = vmatpush1.msra.mxu1 %v731_v30 }
 0x2a8   :  { %969 = vmatprep.subr.mxu0 %v722_v31  ;;  %1040 = vmatprep.subr.mxu1 %v724_v32 }
 0x2a9   :  { %970 = vmatpush1.msra.mxu0 %v721_v33  ;;  %1041 = vmatpush1.msra.mxu1 %v723_v34 }
 0x2aa   :  { %971 = vmatprep.subr.mxu0 %v714_v35  ;;  %1042 = vmatprep.subr.mxu1 %v716_v36 }
 0x2ab   :  { %972 = vmatpush1.msra.mxu0 %v713_v37  ;;  %1043 = vmatpush1.msra.mxu1 %v715_v38  ;;  %v793_v38 = vsub.s32 4, %v776_v10 }
 0x2ac   :  { %973 = vmatprep.subr.mxu0 %v706_v39  ;;  %1044 = vmatprep.subr.mxu1 %v708_v40  ;;  %v801_v39 = vsub.s32 6, %v776_v10  ;;  %v797_v40 = vsub.s32 5, %v776_v10 }
 0x2ad   :  { %974 = vmatpush1.msra.mxu0 %v705_v41  ;;  %1045 = vmatpush1.msra.mxu1 %v707_v42  ;;  %v805_v41 = vsub.s32 7, %v776_v10  ;;  %v794_v42 = vrot.slane %v773_v13, %v793_v38 }
 0x2ae   :  { %975 = vmatprep.subr.mxu0 %v698_v43  ;;  %1046 = vmatprep.subr.mxu1 %v700_v44  ;;  %v802_v43 = vrot.slane %v773_v13, %v801_v39  ;;  %v798_v44 = vrot.slane %v773_v13, %v797_v40 }
 0x2af   :  { %976 = vmatpush1.msra.mxu0 %v697_v45  ;;  %1047 = vmatpush1.msra.mxu1 %v699_v46 }
 0x2b0   :  { %977 = vmatprep.subr.mxu0 %v690_v47  ;;  %1048 = vmatprep.subr.mxu1 %v692_v48  ;;  %v806_v47 = vrot.slane %v773_v13, %v805_v41 }
 0x2b1   :  { %978 = vmatpush1.msra.mxu0 %v689_v49  ;;  %1049 = vmatpush1.msra.mxu1 %v691_v50 }
 0x2b2   :  { %979 = vmatprep.subr.mxu0 %v682_v51  ;;  %1050 = vmatprep.subr.mxu1 %v684_v52 }
 0x2b3   :  { %980 = vmatpush1.msra.mxu0 %v681_v53  ;;  %1051 = vmatpush1.msra.mxu1 %v683_v54 }
 0x2b4   :  { %981 = vmatprep.subr.mxu0 %v674_v55  ;;  %1052 = vmatprep.subr.mxu1 %v676_v56 }
 0x2b5   :  { %982 = vmatpush1.msra.mxu0 %v673_v57  ;;  %1053 = vmatpush1.msra.mxu1 %v675_v58 }
 0x2b6   :  { %983 = vmatprep.subr.mxu0 %v666_v59  ;;  %1054 = vmatprep.subr.mxu1 %v668_v60 }
 0x2b7   :  { %984 = vmatpush1.msra.mxu0 %v665_v61  ;;  %1055 = vmatpush1.msra.mxu1 %v667_v62 }
 0x2b8   :  { %985 = vmatprep.subr.mxu0 %v658_v63  ;;  %1056 = vmatprep.subr.mxu1 %v660_v0 }
 0x2b9   :  { %986 = vmatpush1.msra.mxu0 %v657_v1  ;;  %1057 = vmatpush1.msra.mxu1 %v659_v2 }
 0x2ba   :  { %987 = vmatprep.subr.mxu0 %v650_v3  ;;  %1058 = vmatprep.subr.mxu1 %v652_v4 }
 0x2bb   :  { %988 = vmatpush1.msra.mxu0 %v649_v5  ;;  %1021 = vmatprep.mubr.f32.mxu0 %v1489_v9 }
 0x2bc   :  { %1059 = vmatpush1.msra.mxu1 %v651_v6  ;;  %1092 = vmatprep.mubr.f32.mxu1 %v1489_v9 }
 0x2bd   :  { %1022 = vmatmul.mubr.f32.vlgmr.msra.gmra.mxu0 %v2289_v7  ;;  %1093 = vmatmul.mubr.f32.vlgmr.msra.gmra.mxu1 %v2289_v7 }
 0x35c   :  { %v881_v20 = vpop.f32.mrf.mxu0  ;;  %v952_v9 = vpop.f32.mrf.mxu1 }
 0x35d   :  { %v882_v21 = vadd.f32 %v881_v20, %v778_v16  ;;  %v953_v22 = vadd.f32 %v952_v9, %v786_v17 }
 0x35e   :  { %v883_v23 = vpop.f32.mrf.mxu0  ;;  %v954_v7 = vpop.f32.mrf.mxu1 }
 0x35f   :  { %v1180_v24 = vmul.f32 -1.442695, %v882_v21  ;;  %v1182_v25 = vmul.f32 -1.442695, %v953_v22  ;;  %v884_v26 = vadd.f32 %v883_v23, %v782_v18  ;;  %v955_v27 = vadd.f32 %v954_v7, %v790_v19 }
 0x361   :  { %1435 = vpow2.f32 %v1180_v24  ;;  %v1181_v28 = vmul.f32 -1.442695, %v884_v26  ;;  %v1183_v29 = vmul.f32 -1.442695, %v955_v27 }
 0x362   :  { %1437 = vpow2.f32 %v1182_v25 }
 0x363   :  { %1439 = vpow2.f32 %v1181_v28 }
 0x364   :  { %1441 = vpow2.f32 %v1183_v29 }
 0x36e   :  { %v1436_v30 = vpop.eup %1435 }
 0x36f   :  { %v1438_v31 = vpop.eup %1437  ;;  %v1123_v32 = vadd.f32 1.0, %v1436_v30 }
 0x370   :  { %v1440_v33 = vpop.eup %1439  ;;  %v1125_v34 = vadd.f32 1.0, %v1438_v31 }
 0x371   :  { %v1442_v35 = vpop.eup %1441  ;;  %1443 = vrcp.f32 %v1123_v32  ;;  %v1124_v36 = vadd.f32 1.0, %v1440_v33 }
 0x372   :  { %1445 = vrcp.f32 %v1125_v34  ;;  %v1126_v37 = vadd.f32 1.0, %v1442_v35 }
 0x373   :  { %1447 = vrcp.f32 %v1124_v36 }
 0x374   :  { %1449 = vrcp.f32 %v1126_v37 }
 0x37d   :  { %v1023_v45 = vpop.f32.mrf.mxu0  ;;  %v1094_v46 = vpop.f32.mrf.mxu1 }
 0x37e   :  { %v1444_v48 = vpop.eup %1443  ;;  %v1024_v49 = vadd.f32 %v1023_v45, %v794_v42  ;;  %v1095_v50 = vadd.f32 %v1094_v46, %v802_v43 }
 0x37f   :  { %v1446_v51 = vpop.eup %1445  ;;  %v1147_v52 = vmul.f32 5.0, %v1444_v48  ;;  %v1025_v53 = vpop.f32.mrf.mxu0 }
 0x380   :  { %v1096_v54 = vpop.f32.mrf.mxu1  ;;  %v1448_v55 = vpop.eup %1447  ;;  %v1149_v56 = vmul.f32 5.0, %v1446_v51  ;;  %v1184_v57 = vmul.f32 -1.442695, %v1024_v49  ;;  %v1186_v58 = vmul.f32 -1.442695, %v1095_v50  ;;  %v1026_v59 = vadd.f32 %v1025_v53, %v798_v44 }
 0x381   :  { %v1450_v60 = vpop.eup %1449  ;;  %1155 = vst [vmem:[#allocation2] sm:$0xff] %v1147_v52  ;;  %v1148_v61 = vmul.f32 5.0, %v1448_v55  ;;  %v1097_v62 = vadd.f32 %v1096_v54, %v806_v47 }
 0x382   :  { %1157 = vst [vmem:[#allocation2 + $0x10] sm:$0xff] %v1149_v56  ;;  %v1150_v63 = vmul.f32 5.0, %v1450_v60  ;;  %1451 = vpow2.f32 %v1184_v57  ;;  %v1185_v0 = vmul.f32 -1.442695, %v1026_v59 }
 0x383   :  { %1156 = vst [vmem:[#allocation2 + $0x8] sm:$0xff] %v1148_v61  ;;  %1453 = vpow2.f32 %v1186_v58  ;;  %v1187_v1 = vmul.f32 -1.442695, %v1097_v62 }
 0x384   :  { %1158 = vst [vmem:[#allocation2 + $0x18] sm:$0xff] %v1150_v63  ;;  %1455 = vpow2.f32 %v1185_v0 }
 0x385   :  { %1457 = vpow2.f32 %v1187_v1 }
 0x38f   :  { %v1452_v2 = vpop.eup %1451 }
 0x390   :  { %v1454_v3 = vpop.eup %1453  ;;  %v1127_v4 = vadd.f32 1.0, %v1452_v2 }
 0x391   :  { %v1456_v5 = vpop.eup %1455  ;;  %v1129_v6 = vadd.f32 1.0, %v1454_v3 }
 0x392   :  { %v1458_v8 = vpop.eup %1457  ;;  %1459 = vrcp.f32 %v1127_v4  ;;  %v1128_v10 = vadd.f32 1.0, %v1456_v5 }
 0x393   :  { %1461 = vrcp.f32 %v1129_v6  ;;  %v1130_v11 = vadd.f32 1.0, %v1458_v8 }
 0x394   :  { %1463 = vrcp.f32 %v1128_v10 }
 0x395   :  { %1465 = vrcp.f32 %v1130_v11 }
 0x39f   :  { %v1460_v12 = vpop.eup %1459 }
 0x3a0   :  { %v1462_v13 = vpop.eup %1461  ;;  %v1151_v14 = vmul.f32 5.0, %v1460_v12 }
 0x3a1   :  { %v1464_v15 = vpop.eup %1463  ;;  %v1153_v16 = vmul.f32 5.0, %v1462_v13 }
 0x3a2   :  { %v1466_v17 = vpop.eup %1465  ;;  %1159 = vst [vmem:[#allocation2 + $0x20] sm:$0xff] %v1151_v14  ;;  %v1152_v18 = vmul.f32 5.0, %v1464_v15 }
 0x3a3   :  { %1161 = vst [vmem:[#allocation2 + $0x30] sm:$0xff] %v1153_v16  ;;  %v1154_v19 = vmul.f32 5.0, %v1466_v17 }
 0x3a4   :  { %1160 = vst [vmem:[#allocation2 + $0x28] sm:$0xff] %v1152_v18 }
 0x3a5   :  { %1162 = vst [vmem:[#allocation2 + $0x38] sm:$0xff] %v1154_v19 }
 0x3a6   :  { %1478 = shalt.err (!%p1475_p4)
}
 0x3a7   :  { %1172 = dma.vmem_to_hbm [thread:$0]  %s1170_s8, 1024, %s2498_s9, [#allocation3]  }
 0x3a8   :  { %1487 = dma.done.wait [#allocation3], 1024  }
 0x3a9   :  { %1488 = vsyncadd [#allocation3], 4294966272 }
 0x3aa   :  { %1176 = vsyncpa [#allocation3], 1 }

</bundles_post_ra>
